<compile_context>
chip_gen: v5e
topology: v5e:2x2
jax: 0.10.0
libtpu: 0.0.40
codegen_flags: <defaults>
</compile_context>

<pallas_src>
import functools

import jax
import jax.numpy as jnp
from jax.experimental import pallas as pl
from jax.experimental.pallas import tpu as pltpu


_TARGET_BLOCK_BYTES = 4 << 20  # ~4 MiB blocks: roofline plateau on v5e/v6e and
                               # fits default scoped VMEM everywhere.  (v7x
                               # could use ~8 MiB + pl.Buffered(3), but that
                               # needs vmem_limit_bytes raised on v5e, so keep
                               # the portable setting.)
_MAX_LANE_TILE = 16384         # caps the in-kernel fold unroll length


def _round_up(v, m):
    return ((v + m - 1) // m) * m


def _max_identity(dtype):
    """Dtype-aware identity element for a max reduction."""
    dtype = jnp.dtype(dtype)
    if jnp.issubdtype(dtype, jnp.floating):
        return jnp.array(-jnp.inf, dtype)
    if jnp.issubdtype(dtype, jnp.integer):
        return jnp.array(jnp.iinfo(dtype).min, dtype)
    if dtype == jnp.bool_:
        return jnp.array(False, dtype)
    raise NotImplementedError(f"unsupported dtype {dtype}")


# ---------------------------------------------------------------------------
# channels-first path: x2d (R, L) -> out (1, R), reduce over lanes (L)
# ---------------------------------------------------------------------------
def _rows_kernel(x_ref, o_ref, acc_ref, *, l_total, tl, nl):
    """x_ref: (TR, TL) block of the (R, L) slab.  o_ref: (1, TR) lane-dense."""
    x = x_ref[...]

    if nl == 1:
        # Whole length fits in one block: direct lane reduce, no accumulator.
        o_ref[...] = jnp.max(x, axis=-1)[None, :].astype(o_ref.dtype)
        return

    l_idx = pl.program_id(1)
    ident = _max_identity(x.dtype)
    n_chunks = tl // 128  # tl is a multiple of 128 whenever nl > 1

    def fold128(v):
        # Fold TL lanes into 128 lanes with elementwise maxima (VPU only;
        # static 128-aligned slices are pure vreg selection, no XLU).
        acc = v[:, 0:128]
        for j in range(1, n_chunks):
            acc = jnp.maximum(acc, v[:, j * 128:(j + 1) * 128])
        return acc

    @pl.when(l_idx == 0)
    def _():
        acc_ref[...] = jnp.full(acc_ref.shape, ident, acc_ref.dtype)

    if l_total % tl != 0:
        # Mask only the ragged final block; interior blocks stay unmasked.
        @pl.when(l_idx < nl - 1)
        def _():
            acc_ref[...] = jnp.maximum(acc_ref[...], fold128(x))

        @pl.when(l_idx == nl - 1)
        def _():
            lane = jax.lax.broadcasted_iota(jnp.int32, x.shape, 1)
            valid = (l_idx * tl + lane) < l_total
            acc_ref[...] = jnp.maximum(acc_ref[...],
                                       fold128(jnp.where(valid, x, ident)))
    else:
        acc_ref[...] = jnp.maximum(acc_ref[...], fold128(x))

    @pl.when(l_idx == nl - 1)
    def _():
        # One lane reduce + relayout per row tile (deferred off the per-step
        # critical path); lane-dense (1, TR) store.
        o_ref[...] = jnp.max(acc_ref[...], axis=-1)[None, :].astype(o_ref.dtype)


def _pool_channels_first(x):
    """x: (N, C, L) -> (N, C), max over L."""
    n, c, l = x.shape
    r = n * c
    itemsize = jnp.dtype(x.dtype).itemsize
    x2d = x.reshape(r, l)  # free reshape (contiguous fold of batch+channels)

    # Row tile (sublanes of input, lanes of the output block).
    tr_max = 512
    if r <= tr_max:
        tr = r
    else:
        tr = _round_up(pl.cdiv(r, pl.cdiv(r, tr_max)), 128)
    # v7x has 2 TensorCores and only the "parallel" axis is megacore-sharded:
    # guarantee >= 2 row blocks when the per-row reduction is long.
    if pl.cdiv(r, tr) == 1 and r > 128 and l >= 1024:
        tr = _round_up(pl.cdiv(r, 2), 128)

    # Length tile (lanes): byte-balanced so tr*tl*itemsize ~= 4 MiB,
    # 128-aligned, split evenly so ragged tails stay small.
    tl_cap = (_TARGET_BLOCK_BYTES // (max(tr, 8) * itemsize)) // 128 * 128
    tl_cap = int(min(max(tl_cap, 128), _MAX_LANE_TILE))
    if l <= tl_cap:
        tl = l
    else:
        tl = _round_up(pl.cdiv(l, pl.cdiv(l, tl_cap)), 128)

    nr, nl = pl.cdiv(r, tr), pl.cdiv(l, tl)
    kernel = functools.partial(_rows_kernel, l_total=l, tl=tl, nl=nl)

    out = pl.pallas_call(
        kernel,
        out_shape=jax.ShapeDtypeStruct((1, r), x.dtype),
        grid_spec=pltpu.PrefetchScalarGridSpec(
            num_scalar_prefetch=0,
            grid=(nr, nl),
            in_specs=[pl.BlockSpec((tr, tl), lambda i, j: (i, j))],
            # Same output block across the (last) reduction axis -> resident;
            # written once per row tile, lane-dense.
            out_specs=pl.BlockSpec((1, tr), lambda i, j: (0, i)),
            scratch_shapes=[pltpu.VMEM((tr, 128), x.dtype)],
        ),
        compiler_params=pltpu.CompilerParams(
            dimension_semantics=("parallel", "arbitrary")),
        cost_estimate=pl.CostEstimate(
            flops=r * l, transcendentals=0,
            bytes_accessed=r * l * itemsize + r * itemsize),
    )(x2d)
    return out.reshape(n, c)


# ---------------------------------------------------------------------------
# channels_last path: x (N, L, C) -> out (N, 1, C), reduce over sublanes (L)
# ---------------------------------------------------------------------------
def _steps_kernel(x_ref, o_ref, *, l_total, tl, nl):
    """x_ref: (TL, TC) block of one sample (N squeezed).  o_ref: (1, TC)."""
    x = x_ref[...]

    if nl == 1:
        o_ref[...] = jnp.max(x, axis=0, keepdims=True).astype(o_ref.dtype)
        return

    l_idx = pl.program_id(2)
    ident = _max_identity(x.dtype)

    @pl.when(l_idx == 0)
    def _():
        o_ref[...] = jnp.full(o_ref.shape, ident, o_ref.dtype)

    if l_total % tl != 0:
        @pl.when(l_idx < nl - 1)
        def _():
            o_ref[...] = jnp.maximum(
                o_ref[...], jnp.max(x, axis=0, keepdims=True).astype(o_ref.dtype))

        @pl.when(l_idx == nl - 1)
        def _():
            sub = jax.lax.broadcasted_iota(jnp.int32, x.shape, 0)
            valid = (l_idx * tl + sub) < l_total
            xm = jnp.where(valid, x, ident)
            o_ref[...] = jnp.maximum(
                o_ref[...], jnp.max(xm, axis=0, keepdims=True).astype(o_ref.dtype))
    else:
        o_ref[...] = jnp.maximum(
            o_ref[...], jnp.max(x, axis=0, keepdims=True).astype(o_ref.dtype))


def _pool_channels_last(x):
    """x: (N, L, C) -> (N, C), max over L.  No HBM transpose: the reduction is
    carried out over the sublane axis in-kernel."""
    n, l, c = x.shape
    itemsize = jnp.dtype(x.dtype).itemsize

    tc_max = 1024
    if c <= tc_max:
        tc = c
    else:
        tc = _round_up(pl.cdiv(c, pl.cdiv(c, tc_max)), 128)

    tl_cap = (_TARGET_BLOCK_BYTES // (max(tc, 128) * itemsize)) // 8 * 8
    tl_cap = int(min(max(tl_cap, 8), _MAX_LANE_TILE))
    if l <= tl_cap:
        tl = l
    else:
        tl = _round_up(pl.cdiv(l, pl.cdiv(l, tl_cap)), 8)

    ncb, nlb = pl.cdiv(c, tc), pl.cdiv(l, tl)
    kernel = functools.partial(_steps_kernel, l_total=l, tl=tl, nl=nlb)

    out = pl.pallas_call(
        kernel,
        out_shape=jax.ShapeDtypeStruct((n, 1, c), x.dtype),
        grid_spec=pltpu.PrefetchScalarGridSpec(
            num_scalar_prefetch=0,
            grid=(n, ncb, nlb),
            in_specs=[pl.BlockSpec((None, tl, tc),
                                   lambda b, ci, li: (b, li, ci))],
            # Resident across the (last) L reduction axis; lane-dense (1, TC).
            out_specs=pl.BlockSpec((None, 1, tc),
                                   lambda b, ci, li: (b, 0, ci)),
        ),
        compiler_params=pltpu.CompilerParams(
            dimension_semantics=("parallel", "parallel", "arbitrary")),
        cost_estimate=pl.CostEstimate(
            flops=n * l * c, transcendentals=0,
            bytes_accessed=n * l * c * itemsize + n * c * itemsize),
    )(x)
    return out.reshape(n, c)


def global_max_pooling_1d(x, data_format=2):
    """Pallas forward of GlobalMaxPooling1D: max over the step axis."""
    step_axis = 1 if data_format == "channels_last" else 2
    if step_axis == 2:
        return _pool_channels_first(x)   # (N, C, L) -> (N, C)
    return _pool_channels_last(x)        # (N, L, C) -> (N, C)


def _reference(x, data_format=2):
    step_axis = 1 if data_format == "channels_last" else 2
    return jnp.max(x, axis=step_axis)


if __name__ == "__main__":
    key = jax.random.PRNGKey(0)
    k1, k2, k3, k4 = jax.random.split(key, 4)

    # Default data_format=2: input (N, C, L), reduce over axis 2.
    N, C, L = 2, 4, 16
    x = jax.random.normal(k1, (N, C, L), jnp.float32)
    out = jax.block_until_ready(global_max_pooling_1d(x))
    ref = _reference(x)
    assert out.shape == ref.shape == (N, C)
    assert jnp.array_equal(out, ref)

    # channels_last: input (N, L, C), reduce over axis 1 (no wrapper transpose).
    x_cl = jax.random.normal(k2, (N, L, C), jnp.float32)
    out_cl = jax.block_until_ready(
        global_max_pooling_1d(x_cl, data_format="channels_last"))
    ref_cl = _reference(x_cl, data_format="channels_last")
    assert out_cl.shape == ref_cl.shape == (N, C)
    assert jnp.array_equal(out_cl, ref_cl)

    # Exercise the multi-block reduction + ragged-tail mask paths (still tiny).
    x_long = jax.random.normal(k3, (2, 4, 20000), jnp.float32)
    out_long = jax.block_until_ready(global_max_pooling_1d(x_long))
    assert jnp.array_equal(out_long, _reference(x_long))

    x_long_cl = jax.random.normal(k4, (2, 20000, 4), jnp.float32)
    out_long_cl = jax.block_until_ready(
        global_max_pooling_1d(x_long_cl, data_format="channels_last"))
    assert jnp.array_equal(out_long_cl,
                           _reference(x_long_cl, data_format="channels_last"))

    print("KERNEL_OK")
</pallas_src>

<mosaic_0001>
module attributes {stable_mosaic.version = 11 : i64} {
  func.func @_rows_kernel(%arg0: i32, %arg1: i32, %arg2: memref<8x16xf32, #tpu.memory_space<vmem>>, %arg3: memref<1x8xf32, #tpu.memory_space<vmem>>, %arg4: memref<8x128xf32, #tpu.memory_space<vmem>>) attributes {dimension_semantics = [#tpu.dimension_semantics<parallel>, #tpu.dimension_semantics<arbitrary>], iteration_bounds = array<i64: 1, 1>, scalar_prefetch = 0 : i64, scratch_operands = 1 : i64, tpu.core_type = #tpu.core_type<tc>, window_params = [{transform_indices = @transform_0, window_bounds = array<i64: 8, 16>}, {transform_indices = @transform_1, window_bounds = array<i64: 1, 8>}]} {
    %c0 = arith.constant 0 : index
    %c0_0 = arith.constant 0 : index
    %0 = vector.load %arg2[%c0, %c0_0] : memref<8x16xf32, #tpu.memory_space<vmem>>, vector<8x16xf32>
    %cst = arith.constant dense<0xFF800000> : vector<8xf32>
    %1 = vector.multi_reduction <maximumf>, %0, %cst [1] : vector<8x16xf32> to vector<8xf32>
    %2 = vector.shape_cast %1 : vector<8xf32> to vector<1x8xf32>
    %c0_1 = arith.constant 0 : index
    %c0_2 = arith.constant 0 : index
    %3 = vector.load %arg3[%c0_1, %c0_2] : memref<1x8xf32, #tpu.memory_space<vmem>>, vector<1x8xf32>
    tpu.vector_store %arg3[%c0_1, %c0_2], %2 {strides = array<i32>} : memref<1x8xf32, #tpu.memory_space<vmem>>, vector<1x8xf32>,
    return
  }
  func.func @transform_0(%arg0: i32, %arg1: i32) -> (i32, i32) {
    %c0_i32 = arith.constant 0 : i32
    return %arg0, %arg1 : i32, i32
  }
  func.func @transform_1(%arg0: i32, %arg1: i32) -> (i32, i32) {
    %c0_i32 = arith.constant 0 : i32
    %c0_i32_0 = arith.constant 0 : i32
    return %c0_i32, %arg0 : i32, i32
  }
}

</mosaic_0001>

<bundles_post_ra>
// kernel: tpu_custom_call.1
= control target key start
LH: loop header
LB: loop body
LE: loop exit
PB: predicated region body
PF: predicated region fallthrough
CT: control target
= control target key end

     0   :  { %6 = vsyncpa [#allocation4], 0  ;;  %s124_s0 = inlined_call_operand.hbm [shape: f32[8,16], index: 0, kind: input, shape index: {}]   ;;  %s125_s1 = inlined_call_operand.hbm [shape: f32[1,8], index: 1, kind: output, shape index: {}]  }
   0x1   :  { %7 = vsyncpa [#allocation5], 0  ;;  %s13_s8 = sshll.u32 %s124_s0, 4  ;;  %s106_s9 = smov [#allocation3]   ;;  %s14_s8 = int_to_ptr.hbm [resolvable:$true] %s13_s8 }
   0x2   :  { %s15_s10 = sshll.u32 %s106_s9, 4  ;;  %s16_s10 = int_to_ptr.vmem [resolvable:$true] %s15_s10 }
   0x3   :  { %18 = dma.hbm_to_vmem [thread:$0]  %s14_s8, 128, %s16_s10, [#allocation4]  }
   0x4   :  { %102 = dma.done.wait [#allocation4], 128  }
   0x5   :  { %103 = vsyncadd [#allocation4], 4294967168  ;;  %vm24_vm0 = vcmask 130048   ;;  %v23_v0 = vld [vmem:[#allocation3] sm:$0xff]  ;;  %v29_v2 = vlaneseq  ;;  %s107_s11 = smov [#allocation6]   ;;  %s42_s15 = sshll.u32 %s125_s1, 4  ;;  %s43_s15 = int_to_ptr.hbm [resolvable:$true] %s42_s15 }
   0x6   :  { %v25_v1 = vsel %vm24_vm0, %v23_v0, -inf  ;;  %s40_s12 = sshll.u32 %s107_s11, 4  ;;  %vm33_vm1 = vcmask 57344   ;;  %s41_s12 = int_to_ptr.vmem [resolvable:$true] %s40_s12 }
   0x7   :  { %26 = vmax.xlane.f32.xlu0 %v25_v1  ;;  %v30_v3 = vand.u32 127, %v29_v2 }
  0x7a   :  { %v27_v4 = vpop.xlane.xlu0 %26 }
  0x7b   :  { %v31_v5 = vperm.slane %v27_v4, %v30_v3 }
  0x7d   :  { %34 = vst.msk [vmem:[#allocation6] sm:$0x1] %vm33_vm1, %v31_v5 }
  0x7e   :  { %45 = dma.vmem_to_hbm [thread:$0]  %s41_s12, 16, %s43_s15, [#allocation5]  }
  0x7f   :  { %104 = dma.done.wait [#allocation5], 16  }
  0x80   :  { %105 = vsyncadd [#allocation5], 4294967280 }
  0x81   :  { %50 = vsyncpa [#allocation4], 1 }
  0x82   :  { %51 = vsyncpa [#allocation5], 1 }

</bundles_post_ra>
